<compile_context>
chip_gen: v5e
topology: v5e:2x2
jax: 0.10.0
libtpu: 0.0.40
codegen_flags: <defaults>
</compile_context>

<pallas_src>
import jax
import jax.numpy as jnp
from jax.experimental import pallas as pl
from jax.experimental.pallas import tpu as pltpu


def _round_up(x, m):
    return (x + m - 1) // m * m


# ---------------------------------------------------------------------------
# Generation-aware defaults
# ---------------------------------------------------------------------------
def _tpu_defaults():
    kind = ""
    try:
        kind = jax.devices()[0].device_kind.lower()
    except Exception:
        pass
    if "v7" in kind:   # 64 MiB VMEM / TC, 2 TCs per chip -> leave headroom
        return {"tm": 512, "tn": 512, "vmem_limit": 48 * 1024 * 1024, "num_tc": 2}
    if "v6" in kind:   # highest compute/BW ratio -> largest row tile
        return {"tm": 1024, "tn": 1024, "vmem_limit": 100 * 1024 * 1024, "num_tc": 1}
    if "v5" in kind:
        return {"tm": 512, "tn": 512, "vmem_limit": 100 * 1024 * 1024, "num_tc": 1}
    # unknown: conservative
    return {"tm": 512, "tn": 512, "vmem_limit": 48 * 1024 * 1024, "num_tc": 1}


def _vmem_estimate(tm, tn, dim_p, out_itemsize, use_scratch):
    """Rough double-buffered working-set estimate in bytes."""
    x_b = 2 * tm * dim_p * 2                # bf16 x tile, double buffered
    whg_b = 2 * dim_p * (2 * tn) * 2        # fused Wh^T|Wg^T tile
    wo_b = 2 * tn * dim_p * 2               # Wo^T tile
    out_b = 2 * tm * dim_p * out_itemsize   # output tile
    acc_b = tm * dim_p * 4 if use_scratch else 0
    tmp_b = 4 * tm * (2 * tn) * 4           # f32 hg/hidden/gate/act temporaries
    return x_b + whg_b + wo_b + out_b + acc_b + tmp_b


def _pick_tm(M, tm, num_tc):
    m_16 = _round_up(max(M, 1), 16)         # bf16 sublane-pack friendly rows
    tm_eff = min(tm, m_16)
    # On a 2-TC chip make sure the "parallel" row axis has >= 2 tiles when possible.
    if num_tc >= 2 and tm_eff >= m_16 and m_16 >= 32:
        tm_eff = _round_up(-(-m_16 // 2), 16)
    return tm_eff


# ---------------------------------------------------------------------------
# Kernels
# ---------------------------------------------------------------------------
def _ffn_body(x_ref, whg_ref, wo_t_ref, acc_like_ref):
    """One (tm, dim_p) row tile x one tn slice of dim_inner; accumulate f32."""
    tn = whg_ref.shape[1] // 2
    x = x_ref[...]                                                        # (tm, dim_p) bf16
    # Fused hidden/gate matmul: one MXU dot, x read once.
    hg = jnp.dot(x, whg_ref[...], preferred_element_type=jnp.float32)    # (tm, 2*tn) f32
    hidden = hg[:, :tn]
    gate = hg[:, tn:]
    # SiLU(gate) * hidden in f32 (VPU + EUP sigmoid).
    act = gate * jax.nn.sigmoid(gate) * hidden
    # TODO(synk): dropout omitted (p=0.0 / eval-mode identity in this config).
    acc_like_ref[...] += jnp.dot(act.astype(wo_t_ref.dtype), wo_t_ref[...],
                                 preferred_element_type=jnp.float32)     # (tm, dim_p)


def _ffn_kernel_f32_out(x_ref, whg_ref, wo_t_ref, o_ref):
    """f32 output: accumulate directly into the j-invariant output block."""
    @pl.when(pl.program_id(1) == 0)
    def _init():
        o_ref[...] = jnp.zeros_like(o_ref)

    _ffn_body(x_ref, whg_ref, wo_t_ref, o_ref)


def _ffn_kernel_cast_out(x_ref, whg_ref, wo_t_ref, o_ref, acc_ref):
    """Narrow (e.g. bf16) output: f32 VMEM accumulator, cast on the last j step."""
    j = pl.program_id(1)

    @pl.when(j == 0)
    def _init():
        acc_ref[...] = jnp.zeros_like(acc_ref)

    _ffn_body(x_ref, whg_ref, wo_t_ref, acc_ref)

    @pl.when(j == pl.num_programs(1) - 1)
    def _finalize():
        o_ref[...] = acc_ref[...].astype(o_ref.dtype)


# ---------------------------------------------------------------------------
# One-time weight preparation (hoisted out of the per-call hot path)
# ---------------------------------------------------------------------------
def prepare_ffn_weights(wh, wg, hidden_scale, gate_scale, wo, *, tn=None,
                        weight_dtype=jnp.bfloat16):
    """Normalize, fold scales, transpose, pad, fuse and cast the weights once."""
    dim_inner, dim = wh.shape
    assert wg.shape == (dim_inner, dim)
    assert wo.shape == (dim, dim_inner)

    defaults = _tpu_defaults()
    if tn is None:
        tn = defaults["tn"]

    dim_p = _round_up(dim, 128)
    din_128 = _round_up(dim_inner, 128)
    tn_eff = min(tn, din_128)
    # Cap tn so the streamed weight tiles take at most ~half of the VMEM budget.
    while tn_eff > 128 and 12 * tn_eff * dim_p > defaults["vmem_limit"] // 2:
        tn_eff //= 2
    tn_eff = max(128, tn_eff // 128 * 128)
    din_p = _round_up(dim_inner, tn_eff)

    def l2norm(t, axis):
        return t / jnp.maximum(jnp.linalg.norm(t, axis=axis, keepdims=True), 1e-12)

    dim_sqrt = float(dim) ** 0.5
    wh_n = l2norm(wh.astype(jnp.float32), -1) * hidden_scale.astype(jnp.float32)[:, None]
    wg_n = l2norm(wg.astype(jnp.float32), -1) * (
        gate_scale.astype(jnp.float32) * dim_sqrt)[:, None]
    wo_n = l2norm(wo.astype(jnp.float32), 0)

    # Pre-transposed, zero-padded MXU operands.
    wh_t = jnp.pad(wh_n.T, ((0, dim_p - dim), (0, din_p - dim_inner)))    # (dim_p, din_p)
    wg_t = jnp.pad(wg_n.T, ((0, dim_p - dim), (0, din_p - dim_inner)))    # (dim_p, din_p)
    wo_t = jnp.pad(wo_n.T, ((0, din_p - dim_inner), (0, dim_p - dim)))    # (din_p, dim_p)

    # Interleave per-tile: block j of the fused operand = [Wh^T tile j | Wg^T tile j].
    n_j = din_p // tn_eff
    whg = jnp.concatenate(
        [wh_t.reshape(dim_p, n_j, 1, tn_eff),
         wg_t.reshape(dim_p, n_j, 1, tn_eff)], axis=2,
    ).reshape(dim_p, 2 * din_p).astype(weight_dtype)
    wo_t = wo_t.astype(weight_dtype)

    return {"whg": whg, "wo_t": wo_t, "dim": dim, "dim_inner": dim_inner,
            "dim_p": dim_p, "din_p": din_p, "tn": tn_eff}


# ---------------------------------------------------------------------------
# Per-call launcher
# ---------------------------------------------------------------------------
def feedforward_pallas(x, prepared, *, tm=None):
    """x: (..., dim). `prepared` comes from prepare_ffn_weights (cached)."""
    orig_shape = x.shape
    dim = prepared["dim"]
    assert orig_shape[-1] == dim
    x2d = x.reshape(-1, dim)
    M = x2d.shape[0]

    defaults = _tpu_defaults()
    if tm is None:
        tm = defaults["tm"]

    dim_p = prepared["dim_p"]
    din_p = prepared["din_p"]
    tn_eff = prepared["tn"]
    whg = prepared["whg"]
    wo_t = prepared["wo_t"]

    out_dtype = x.dtype
    out_isz = jnp.dtype(out_dtype).itemsize
    use_scratch = out_dtype != jnp.float32     # f32 out accumulates in-place

    tm_eff = _pick_tm(M, tm, defaults["num_tc"])
    vmem_limit = defaults["vmem_limit"]
    while tm_eff > 128 and _vmem_estimate(tm_eff, tn_eff, dim_p, out_isz,
                                          use_scratch) > int(0.9 * vmem_limit):
        tm_eff = _round_up(max(128, tm_eff // 2), 16)
    m_p = _round_up(M, tm_eff)

    # Lane-dense / tile-friendly zero padding (exact: padded rows/cols sliced off).
    xb = jnp.pad(x2d, ((0, m_p - M), (0, dim_p - dim))).astype(jnp.bfloat16)

    grid = (m_p // tm_eff, din_p // tn_eff)

    weight_bytes = (whg.size + wo_t.size) * whg.dtype.itemsize
    cost = pl.CostEstimate(
        flops=2 * m_p * dim_p * din_p * 3,
        transcendentals=m_p * din_p,
        bytes_accessed=xb.size * xb.dtype.itemsize
        + weight_bytes * grid[0]                 # weights re-streamed per row tile
        + m_p * dim_p * out_isz,
    )

    if use_scratch:
        kernel = _ffn_kernel_cast_out
        scratch = [pltpu.VMEM((tm_eff, dim_p), jnp.float32)]
    else:
        kernel = _ffn_kernel_f32_out
        scratch = []

    out_p = pl.pallas_call(
        kernel,
        out_shape=jax.ShapeDtypeStruct((m_p, dim_p), out_dtype),
        grid_spec=pltpu.PrefetchScalarGridSpec(
            num_scalar_prefetch=0,
            grid=grid,
            in_specs=[
                pl.BlockSpec((tm_eff, dim_p), lambda i, j: (i, 0)),       # x row tile
                pl.BlockSpec((dim_p, 2 * tn_eff), lambda i, j: (0, j)),   # [Wh^T|Wg^T] tile
                pl.BlockSpec((tn_eff, dim_p), lambda i, j: (j, 0)),       # Wo^T row tile
            ],
            out_specs=pl.BlockSpec((tm_eff, dim_p), lambda i, j: (i, 0)),
            scratch_shapes=scratch,
        ),
        compiler_params=pltpu.CompilerParams(
            dimension_semantics=("parallel", "arbitrary"),
            vmem_limit_bytes=vmem_limit,
        ),
        cost_estimate=cost,
    )(xb, whg, wo_t)

    return out_p[:M, :dim].reshape(orig_shape)


# ---------------------------------------------------------------------------
# Pure-JAX f32 reference mirroring the PyTorch forward
# ---------------------------------------------------------------------------
def feedforward_ref(x, wh, wg, hidden_scale, gate_scale, wo):
    def l2norm(t, axis):
        return t / jnp.maximum(jnp.linalg.norm(t, axis=axis, keepdims=True), 1e-12)

    dim = x.shape[-1]
    wh_n = l2norm(wh, -1)
    wg_n = l2norm(wg, -1)
    wo_n = l2norm(wo, 0)
    hidden = x @ wh_n.T * hidden_scale
    gate = x @ wg_n.T * gate_scale * (dim ** 0.5)
    act = jax.nn.silu(gate) * hidden
    return act @ wo_n.T


if __name__ == "__main__":
    # Module config: FeedForward(dim=32, dim_inner=48) -> dim_inner_eff = int(48*2/3) = 32
    dim = 32
    dim_inner_arg = 48
    dim_inner = int(dim_inner_arg * 2 / 3)   # 32
    batch, seq = 2, 8                        # M = 16 tokens

    key = jax.random.PRNGKey(0)
    kx, kh, kg, ko = jax.random.split(key, 4)

    x = jax.random.normal(kx, (batch, seq, dim), dtype=jnp.float32)
    wh = jax.random.normal(kh, (dim_inner, dim), dtype=jnp.float32) * 0.1
    wg = jax.random.normal(kg, (dim_inner, dim), dtype=jnp.float32) * 0.1
    wo = jax.random.normal(ko, (dim, dim_inner), dtype=jnp.float32) * 0.1
    hidden_scale = jnp.ones((dim_inner,), dtype=jnp.float32)
    gate_scale = jnp.ones((dim_inner,), dtype=jnp.float32)

    # Weight prep is hoisted out of the hot path: do it once and reuse.
    prepared = prepare_ffn_weights(wh, wg, hidden_scale, gate_scale, wo)

    ref = feedforward_ref(x.reshape(-1, dim), wh, wg, hidden_scale, gate_scale,
                          wo).reshape(batch, seq, dim)

    # f32 activations -> f32 output, accumulate directly into the output block.
    out_f32 = feedforward_pallas(x, prepared)
    jax.block_until_ready(out_f32)
    assert out_f32.dtype == x.dtype
    assert jnp.allclose(out_f32, ref, atol=5e-2, rtol=5e-2), "f32 mismatch vs reference"

    # bf16 activations -> bf16 output path (f32 scratch accumulator, bf16 writeback).
    out_bf16 = feedforward_pallas(x.astype(jnp.bfloat16), prepared)
    jax.block_until_ready(out_bf16)
    assert out_bf16.dtype == jnp.bfloat16
    assert jnp.allclose(out_bf16.astype(jnp.float32), ref, atol=2e-1, rtol=2e-1), \
        "bf16 mismatch vs reference"

    print("KERNEL_OK")
</pallas_src>

<mosaic_0001>
module attributes {stable_mosaic.version = 11 : i64} {
  func.func @_ffn_kernel_f32_out(%arg0: i32, %arg1: i32, %arg2: memref<16x128xbf16, #tpu.memory_space<vmem>>, %arg3: memref<128x256xbf16, #tpu.memory_space<vmem>>, %arg4: memref<128x128xbf16, #tpu.memory_space<vmem>>, %arg5: memref<16x128xf32, #tpu.memory_space<vmem>>) attributes {dimension_semantics = [#tpu.dimension_semantics<parallel>, #tpu.dimension_semantics<arbitrary>], iteration_bounds = array<i64: 1, 1>, scalar_prefetch = 0 : i64, scratch_operands = 0 : i64, tpu.core_type = #tpu.core_type<tc>, window_params = [{transform_indices = @transform_0, window_bounds = array<i64: 16, 128>}, {transform_indices = @transform_1, window_bounds = array<i64: 128, 256>}, {transform_indices = @transform_2, window_bounds = array<i64: 128, 128>}, {transform_indices = @transform_3, window_bounds = array<i64: 16, 128>}]} {
    %c0_i32 = arith.constant 0 : i32
    %0 = arith.cmpi eq, %arg1, %c0_i32 : i32
    %1 = arith.extui %0 : i1 to i32
    %c0_i32_0 = arith.constant 0 : i32
    %2 = arith.cmpi ne, %1, %c0_i32_0 : i32
    scf.if %2 {
      %cst_12 = arith.constant 0.000000e+00 : f32
      %21 = vector.broadcast %cst_12 : f32 to vector<16x128xf32>
      %c0_13 = arith.constant 0 : index
      %c0_14 = arith.constant 0 : index
      %22 = vector.load %arg5[%c0_13, %c0_14] : memref<16x128xf32, #tpu.memory_space<vmem>>, vector<16x128xf32>
      tpu.vector_store %arg5[%c0_13, %c0_14], %21 {strides = array<i32>} : memref<16x128xf32, #tpu.memory_space<vmem>>, vector<16x128xf32>,
    } else {
    }
    %c0 = arith.constant 0 : index
    %c0_1 = arith.constant 0 : index
    %3 = vector.load %arg2[%c0, %c0_1] : memref<16x128xbf16, #tpu.memory_space<vmem>>, vector<16x128xbf16>
    %c0_2 = arith.constant 0 : index
    %c0_3 = arith.constant 0 : index
    %4 = vector.load %arg3[%c0_2, %c0_3] : memref<128x256xbf16, #tpu.memory_space<vmem>>, vector<128x256xbf16>
    %cst = arith.constant dense<0.000000e+00> : vector<16x256xf32>
    %5 = tpu.matmul %3, %4, %cst {dimension_numbers = #tpu.dot_dimension_numbers<[1], [0], [0], [1], [0, 0, 1, 1], [], []>} : vector<16x128xbf16>, vector<128x256xbf16>, vector<16x256xf32> -> vector<16x256xf32>
    %6 = vector.extract_strided_slice %5 {offsets = [0, 0], sizes = [16, 128], strides = [1, 1]} : vector<16x256xf32> to vector<16x128xf32>
    %7 = vector.extract_strided_slice %5 {offsets = [0, 128], sizes = [16, 128], strides = [1, 1]} : vector<16x256xf32> to vector<16x128xf32>
    %8 = arith.negf %7 : vector<16x128xf32>
    %9 = math.exp %8 : vector<16x128xf32>
    %cst_4 = arith.constant 1.000000e+00 : f32
    %10 = vector.broadcast %cst_4 : f32 to vector<16x128xf32>
    %11 = arith.addf %10, %9 : vector<16x128xf32>
    %12 = arith.divf %10, %11 : vector<16x128xf32>
    %13 = arith.mulf %7, %12 : vector<16x128xf32>
    %14 = arith.mulf %13, %6 : vector<16x128xf32>
    %c0_5 = arith.constant 0 : index
    %c0_6 = arith.constant 0 : index
    %15 = vector.load %arg5[%c0_5, %c0_6] : memref<16x128xf32, #tpu.memory_space<vmem>>, vector<16x128xf32>
    %16 = arith.truncf %14 : vector<16x128xf32> to vector<16x128xbf16>
    %c0_7 = arith.constant 0 : index
    %c0_8 = arith.constant 0 : index
    %17 = vector.load %arg4[%c0_7, %c0_8] : memref<128x128xbf16, #tpu.memory_space<vmem>>, vector<128x128xbf16>
    %cst_9 = arith.constant dense<0.000000e+00> : vector<16x128xf32>
    %18 = tpu.matmul %16, %17, %cst_9 {dimension_numbers = #tpu.dot_dimension_numbers<[1], [0], [0], [1], [0, 0, 1, 1], [], []>} : vector<16x128xbf16>, vector<128x128xbf16>, vector<16x128xf32> -> vector<16x128xf32>
    %19 = arith.addf %15, %18 : vector<16x128xf32>
    %c0_10 = arith.constant 0 : index
    %c0_11 = arith.constant 0 : index
    %20 = vector.load %arg5[%c0_10, %c0_11] : memref<16x128xf32, #tpu.memory_space<vmem>>, vector<16x128xf32>
    tpu.vector_store %arg5[%c0_10, %c0_11], %19 {strides = array<i32>} : memref<16x128xf32, #tpu.memory_space<vmem>>, vector<16x128xf32>,
    return
  }
  func.func @transform_0(%arg0: i32, %arg1: i32) -> (i32, i32) {
    %c0_i32 = arith.constant 0 : i32
    %c0_i32_0 = arith.constant 0 : i32
    return %arg0, %c0_i32 : i32, i32
  }
  func.func @transform_1(%arg0: i32, %arg1: i32) -> (i32, i32) {
    %c0_i32 = arith.constant 0 : i32
    %c0_i32_0 = arith.constant 0 : i32
    return %c0_i32, %arg1 : i32, i32
  }
  func.func @transform_2(%arg0: i32, %arg1: i32) -> (i32, i32) {
    %c0_i32 = arith.constant 0 : i32
    %c0_i32_0 = arith.constant 0 : i32
    return %arg1, %c0_i32 : i32, i32
  }
  func.func @transform_3(%arg0: i32, %arg1: i32) -> (i32, i32) {
    %c0_i32 = arith.constant 0 : i32
    %c0_i32_0 = arith.constant 0 : i32
    return %arg0, %c0_i32 : i32, i32
  }
}

</mosaic_0001>

<bundles_post_ra>
// kernel: tpu_custom_call.1
= control target key start
LH: loop header
LB: loop body
LE: loop exit
PB: predicated region body
PF: predicated region fallthrough
CT: control target
= control target key end

     0   :  { %8 = vsyncpa [#allocation3], 0  ;;  %s639_s0 = inlined_call_operand.hbm [shape: bf16[16,128], index: 0, kind: input, shape index: {}]   ;;  %s640_s1 = inlined_call_operand.hbm [shape: bf16[128,256], index: 1, kind: input, shape index: {}]   ;;  %s641_s2 = inlined_call_operand.hbm [shape: bf16[128,128], index: 2, kind: input, shape index: {}]   ;;  %s642_s3 = inlined_call_operand.hbm [shape: f32[16,128], index: 3, kind: output, shape index: {}]  }
   0x1   :  { %9 = vsyncpa [#allocation6], 0  ;;  %s28_s14 = sshll.u32 %s640_s1, 4  ;;  %s29_s14 = int_to_ptr.hbm [resolvable:$true] %s28_s14 }
   0x2   :  { %10 = vsyncpa [#allocation4], 0  ;;  %s593_s15 = smov [#allocation5]   ;;  %s15_s19 = sshll.u32 %s639_s0, 4  ;;  %s16_s19 = int_to_ptr.hbm [resolvable:$true] %s15_s19 }
   0x3   :  { %s30_s16 = sshll.u32 %s593_s15, 4  ;;  %s594_s20 = smov 128   ;;  %s31_s16 = int_to_ptr.vmem [resolvable:$true] %s30_s16 }
   0x4   :  { %s595_s21 = smov 8   ;;  %s596_s22 = smov [#allocation2]  }
   0x5   :  { %36 = dma.hbm_to_vmem [thread:$0]  %s29_s14, 2048, %s31_s16, [#allocation6], %s594_s20, %s594_s20, %s595_s21  }
   0x6   :  { %s17_s23 = sshll.u32 %s596_s22, 4  ;;  %s597_s1 = smov 64   ;;  %s18_s23 = int_to_ptr.vmem [resolvable:$true] %s17_s23 }
   0x7   :  { %s598_s24 = smov 4   ;;  %s41_s27 = sshll.u32 %s641_s2, 4  ;;  %s42_s27 = int_to_ptr.hbm [resolvable:$true] %s41_s27 }
   0x8   :  { %23 = dma.hbm_to_vmem [thread:$0]  %s16_s19, 128, %s18_s23, [#allocation3], %s597_s1, %s597_s1, %s598_s24  }
   0x9   :  { %s599_s28 = smov [#allocation7]  }
   0xa   :  { %s43_s0 = sshll.u32 %s599_s28, 4  ;;  %s44_s0 = int_to_ptr.vmem [resolvable:$true] %s43_s0 }
   0xb   :  { %49 = dma.hbm_to_vmem [thread:$0]  %s42_s27, 1024, %s44_s0, [#allocation6], %s597_s1, %s597_s1, %s598_s24  }
   0xc   :  { %587 = dma.done.wait [#allocation3], 128  }
   0xd   :  { %588 = vsyncadd [#allocation3], 4294967168 }
   0xe   :  { %589 = dma.done.wait [#allocation6], 3072  }
   0xf   :  { %590 = vsyncadd [#allocation6], 4294964224  ;;  %v464_v0 = vld [vmem:[#allocation5 + $0x74] sm:$0xf]  ;;  %v411_v1 = vld [vmem:[#allocation5 + $0x78] sm:$0xf0] }
  0x10   :  { %v462_v2 = vld [vmem:[#allocation5 + $0x64] sm:$0xf]  ;;  %v414_v3 = vor.u32 %v464_v0, %v411_v1  ;;  %v403_v4 = vld [vmem:[#allocation5 + $0x68] sm:$0xf0]  ;;  %v460_v6 = vld [vmem:[#allocation5 + $0x54] sm:$0xf] }
  0x11   :  { %v406_v5 = vor.u32 %v462_v2, %v403_v4  ;;  %v395_v7 = vld [vmem:[#allocation5 + $0x58] sm:$0xf0]  ;;  %v409_v8 = vld [vmem:[#allocation5 + $0x70] sm:$0xf]  ;;  %v465_v9 = vld [vmem:[#allocation5 + $0x74] sm:$0xf0] }
  0x12   :  { %186 = vmatpush.bf16.msra.mxu1 %v414_v3  ;;  %v410_v10 = vor.u32 %v465_v9, %v409_v8  ;;  %v401_v11 = vld [vmem:[#allocation5 + $0x60] sm:$0xf]  ;;  %v463_v12 = vld [vmem:[#allocation5 + $0x64] sm:$0xf0]  ;;  %v398_v13 = vor.u32 %v460_v6, %v395_v7  ;;  %v458_v14 = vld [vmem:[#allocation5 + $0x44] sm:$0xf] }
  0x13   :  { %v402_v15 = vor.u32 %v463_v12, %v401_v11  ;;  %v387_v16 = vld [vmem:[#allocation5 + $0x48] sm:$0xf0]  ;;  %v393_v17 = vld [vmem:[#allocation5 + $0x50] sm:$0xf]  ;;  %v461_v18 = vld [vmem:[#allocation5 + $0x54] sm:$0xf0] }
  0x14   :  { %172 = vmatpush.bf16.msra.mxu0 %v410_v10  ;;  %v390_v19 = vor.u32 %v458_v14, %v387_v16  ;;  %v456_v20 = vld [vmem:[#allocation5 + $0x34] sm:$0xf]  ;;  %v394_v21 = vor.u32 %v461_v18, %v393_v17  ;;  %v379_v22 = vld [vmem:[#allocation5 + $0x38] sm:$0xf0]  ;;  %v385_v23 = vld [vmem:[#allocation5 + $0x40] sm:$0xf] }
  0x15   :  { %v459_v24 = vld [vmem:[#allocation5 + $0x44] sm:$0xf0]  ;;  %v382_v25 = vor.u32 %v456_v20, %v379_v22  ;;  %v454_v26 = vld [vmem:[#allocation5 + $0x24] sm:$0xf]  ;;  %v371_v28 = vld [vmem:[#allocation5 + $0x28] sm:$0xf0] }
  0x16   :  { %187 = vmatpush.bf16.msra.mxu1 %v406_v5  ;;  %v386_v27 = vor.u32 %v459_v24, %v385_v23  ;;  %v377_v29 = vld [vmem:[#allocation5 + $0x30] sm:$0xf]  ;;  %v457_v30 = vld [vmem:[#allocation5 + $0x34] sm:$0xf0]  ;;  %v374_v31 = vor.u32 %v454_v26, %v371_v28  ;;  %v452_v32 = vld [vmem:[#allocation5 + $0x14] sm:$0xf] }
  0x17   :  { %v378_v33 = vor.u32 %v457_v30, %v377_v29  ;;  %v363_v34 = vld [vmem:[#allocation5 + $0x18] sm:$0xf0]  ;;  %v369_v35 = vld [vmem:[#allocation5 + $0x20] sm:$0xf]  ;;  %v455_v36 = vld [vmem:[#allocation5 + $0x24] sm:$0xf0] }
  0x18   :  { %173 = vmatpush.bf16.msra.mxu0 %v402_v15  ;;  %v366_v37 = vor.u32 %v452_v32, %v363_v34  ;;  %v450_v38 = vld [vmem:[#allocation5 + $0x4] sm:$0xf]  ;;  %v370_v39 = vor.u32 %v455_v36, %v369_v35  ;;  %v355_v40 = vld [vmem:[#allocation5 + $0x8] sm:$0xf0]  ;;  %v361_v41 = vld [vmem:[#allocation5 + $0x10] sm:$0xf] }
  0x19   :  { %v453_v42 = vld [vmem:[#allocation5 + $0x14] sm:$0xf0]  ;;  %v358_v43 = vor.u32 %v450_v38, %v355_v40  ;;  %v353_v45 = vld [vmem:[#allocation5] sm:$0xf]  ;;  %v451_v46 = vld [vmem:[#allocation5 + $0x4] sm:$0xf0] }
  0x1a   :  { %188 = vmatpush.bf16.msra.mxu1 %v398_v13  ;;  %v362_v44 = vor.u32 %v453_v42, %v361_v41  ;;  %v449_v47 = vld [vmem:[#allocation2] sm:$0xff]  ;;  %v354_v48 = vor.u32 %v451_v46, %v353_v45  ;;  %v472_v50 = vld [vmem:[#allocation7 + $0x30] sm:$0xff]  ;;  %v471_v51 = vld [vmem:[#allocation7 + $0x28] sm:$0xff]  ;;  %s600_s2 = smov [#allocation8]   ;;  %s333_s5 = sshll.u32 %s642_s3, 4  ;;  %s334_s5 = int_to_ptr.hbm [resolvable:$true] %s333_s5 }
  0x1b   :  { %v473_v49 = vld [vmem:[#allocation7 + $0x38] sm:$0xff]  ;;  %v470_v52 = vld [vmem:[#allocation7 + $0x20] sm:$0xff]  ;;  %v468_v54 = vld [vmem:[#allocation7 + $0x10] sm:$0xff]  ;;  %s331_s29 = sshll.u32 %s600_s2, 4  ;;  %s332_s29 = int_to_ptr.vmem [resolvable:$true] %s331_s29 }
  0x1c   :  { %174 = vmatpush.bf16.msra.mxu0 %v394_v21  ;;  %309 = vmatpush.bf16.msra.mxu2 %v473_v49  ;;  %v469_v53 = vld [vmem:[#allocation7 + $0x18] sm:$0xff]  ;;  %v467_v57 = vld [vmem:[#allocation7 + $0x8] sm:$0xff]  ;;  %v466_v58 = vld [vmem:[#allocation7] sm:$0xff] }
  0x1e   :  { %189 = vmatpush.bf16.msra.mxu1 %v390_v19 }
  0x20   :  { %175 = vmatpush.bf16.msra.mxu0 %v386_v27  ;;  %310 = vmatpush.bf16.msra.mxu2 %v472_v50 }
  0x22   :  { %190 = vmatpush.bf16.msra.mxu1 %v382_v25 }
  0x24   :  { %176 = vmatpush.bf16.msra.mxu0 %v378_v33  ;;  %311 = vmatpush.bf16.msra.mxu2 %v471_v51 }
  0x26   :  { %191 = vmatpush.bf16.msra.mxu1 %v374_v31 }
  0x28   :  { %177 = vmatpush.bf16.msra.mxu0 %v370_v39  ;;  %312 = vmatpush.bf16.msra.mxu2 %v470_v52 }
  0x2a   :  { %192 = vmatpush.bf16.msra.mxu1 %v366_v37 }
  0x2c   :  { %178 = vmatpush.bf16.msra.mxu0 %v362_v44  ;;  %313 = vmatpush.bf16.msra.mxu2 %v469_v53 }
  0x2e   :  { %193 = vmatpush.bf16.msra.mxu1 %v358_v43 }
  0x30   :  { %179 = vmatpush.bf16.msra.mxu0 %v354_v48  ;;  %314 = vmatpush.bf16.msra.mxu2 %v468_v54 }
  0x31   :  { %194 = vmatmul.bf16.vlgmr.msra.gmra.mxu1 %v449_v47 }
  0x33   :  { %180 = vmatmul.bf16.vlgmr.msra.gmra.mxu0 %v449_v47 }
  0x34   :  { %315 = vmatpush.bf16.msra.mxu2 %v467_v57 }
  0x38   :  { %316 = vmatpush.bf16.msra.mxu2 %v466_v58 }
  0xae   :  { %v195_v55 = vpop.f32.mrf.mxu1 }
  0xaf   :  { %v415_v56 = vmul.f32 -1.442695, %v195_v55 }
  0xb0   :  { %v181_v10 = vpop.f32.mrf.mxu0 }
  0xb1   :  { %483 = vpow2.f32 %v415_v56 }
  0xb6   :  { %v197_v59 = vpop.f32.mrf.mxu1 }
  0xb7   :  { %v484_v60 = vpop.eup %483  ;;  %v416_v61 = vmul.f32 -1.442695, %v197_v59 }
  0xb8   :  { %v206_v62 = vadd.f32 1.0, %v484_v60  ;;  %v183_v24 = vpop.f32.mrf.mxu0 }
  0xb9   :  { %485 = vpow2.f32 %v416_v61 }
  0xba   :  { %487 = vrcp.f32 %v206_v62  ;;  %v219_v7 = vand.u32 2147483648, %v206_v62  ;;  %vm213_vm1 = vweird.f32 %v206_v62  ;;  %v217_v8 = vand.u32 2147483647, %v206_v62 }
  0xbc   :  { %v220_v13 = vor.u32 1.1754944e-38, %v219_v7  ;;  %vm218_vm3 = vcmp.eq.f32.partialorder %v217_v8, 8.507059e+37 }
  0xbf   :  { %v486_v63 = vpop.eup %485 }
  0xc0   :  { %v488_v0 = vpop.eup %487  ;;  %v207_v1 = vadd.f32 1.0, %v486_v63 }
  0xc1   :  { %v209_v2 = vmul.f32 %v488_v0, %v206_v62  ;;  %vm214_vm0 = vweird.f32 %v488_v0 }
  0xc2   :  { %489 = vrcp.f32 %v207_v1  ;;  %vm215_vm2 = vmor %vm213_vm1, %vm214_vm0  ;;  %v234_v14 = vand.u32 2147483648, %v207_v1  ;;  %v232_v16 = vand.u32 2147483647, %v207_v1  ;;  %vm228_vm5 = vweird.f32 %v207_v1 }
  0xc3   :  { %v210_v3 = vsub.f32 1.0, %v209_v2 }
  0xc4   :  { %v235_v19 = vor.u32 1.1754944e-38, %v234_v14  ;;  %vm233_vm7 = vcmp.eq.f32.partialorder %v232_v16, 8.507059e+37 }
  0xc5   :  { %v211_v4 = vmul.f32 %v488_v0, %v210_v3 }
  0xc7   :  { %v212_v5 = vadd.f32 %v488_v0, %v211_v4 }
  0xc8   :  { %v490_v6 = vpop.eup %489 }
  0xc9   :  { %v224_v9 = vmul.f32 %v490_v6, %v207_v1  ;;  %v216_v11 = vsel %vm215_vm2, %v488_v0, %v212_v5  ;;  %vm229_vm4 = vweird.f32 %v490_v6 }
  0xca   :  { %v221_v17 = vsel %vm218_vm3, %v220_v13, %v216_v11  ;;  %vm230_vm6 = vmor %vm228_vm5, %vm229_vm4 }
  0xcb   :  { %v225_v12 = vsub.f32 1.0, %v224_v9  ;;  %v238_v20 = vmul.f32 %v221_v17, %v195_v55 }
  0xcd   :  { %v226_v15 = vmul.f32 %v490_v6, %v225_v12  ;;  %v240_v25 = vmul.f32 %v238_v20, %v181_v10 }
  0xcf   :  { %v227_v18 = vadd.f32 %v490_v6, %v226_v15 }
  0xd1   :  { %v231_v21 = vsel %vm230_vm6, %v490_v6, %v227_v18 }
  0xd2   :  { %v236_v22 = vsel %vm233_vm7, %v235_v19, %v231_v21 }
  0xd3   :  { %v239_v23 = vmul.f32 %v236_v22, %v197_v59 }
  0xd5   :  { %v241_v26 = vmul.f32 %v239_v23, %v183_v24 }
  0xd7   :  { %v244_v27 = vpack.c.bf16 %v241_v26, %v240_v25 }
  0xd9   :  { %317 = vmatmul.bf16.vlgmr.msra.gmra.mxu2 %v244_v27 }
 0x15c   :  { %v318_v28 = vpop.f32.mrf.mxu2 }
 0x15d   :  { %325 = vst [vmem:[#allocation8] sm:$0xff] %v318_v28 }
 0x164   :  { %v320_v29 = vpop.f32.mrf.mxu2 }
 0x165   :  { %326 = vst [vmem:[#allocation8 + $0x8] sm:$0xff] %v320_v29 }
 0x166   :  { %339 = dma.vmem_to_hbm [thread:$0]  %s332_s29, 256, %s334_s5, [#allocation4], %s594_s20, %s594_s20, %s595_s21  }
 0x167   :  { %591 = dma.done.wait [#allocation4], 256  }
 0x168   :  { %592 = vsyncadd [#allocation4], 4294967040 }
 0x169   :  { %344 = vsyncpa [#allocation3], 1 }
 0x16a   :  { %345 = vsyncpa [#allocation6], 1 }
 0x16b   :  { %346 = vsyncpa [#allocation4], 1 }

</bundles_post_ra>
